<compile_context>
chip_gen: v7x
topology: tpu7x:2x2x1
jax: 0.10.0
libtpu: 0.0.40
codegen_flags: <defaults>
</compile_context>

<pallas_src>
import jax
import jax.numpy as jnp
from jax.experimental import pallas as pl
from jax.experimental.pallas import tpu as pltpu


def _round_up(x, m):
    return ((x + m - 1) // m) * m


# ---------------------------------------------------------------------------
# Kernels
# ---------------------------------------------------------------------------

def _ff_scale_kernel_resident(scale_ref, x_ref, w1_ref, b1_ref, w2_ref, b2_ref,
                              o_ref):
    # scale_ref: (1,) SMEM  x_ref: (tm, Dp)  w1_ref: (Dp, Hp)  b1_ref: (1, Hp)
    # w2_ref: (Hp, Dp)  b2_ref: (1, Dp)  o_ref: (tm, Dp)
    h = jnp.dot(x_ref[...], w1_ref[...],
                preferred_element_type=jnp.float32) + b1_ref[...]
    h = jax.nn.gelu(h, approximate=True)          # tanh GELU -> EUP slot
    y = jnp.dot(h.astype(w2_ref.dtype), w2_ref[...],
                preferred_element_type=jnp.float32) + b2_ref[...]
    # The Scale module's own compute: multiply fn's output by the scalar,
    # applied on the f32 accumulator before the final cast (free VPU filler).
    o_ref[...] = (y * scale_ref[0]).astype(o_ref.dtype)


def _ff_scale_kernel_hsplit(scale_ref, x_ref, w1_ref, b1_ref, w2_ref, b2_ref,
                            o_ref, acc_ref):
    # H-chunked reduction: grid=(rows, H chunks), acc_ref: (tm, Dp) f32 VMEM.
    k = pl.program_id(1)

    @pl.when(k == 0)
    def _():
        acc_ref[...] = jnp.zeros_like(acc_ref)

    h = jnp.dot(x_ref[...], w1_ref[...],
                preferred_element_type=jnp.float32) + b1_ref[...]
    h = jax.nn.gelu(h, approximate=True)
    acc_ref[...] += jnp.dot(h.astype(w2_ref.dtype), w2_ref[...],
                            preferred_element_type=jnp.float32)

    @pl.when(k == pl.num_programs(1) - 1)
    def _():
        o_ref[...] = ((acc_ref[...] + b2_ref[...]) * scale_ref[0]).astype(o_ref.dtype)


# ---------------------------------------------------------------------------
# Wrapper
# ---------------------------------------------------------------------------

def scale_feedforward(x, w1, b1, w2, b2, scale, *, tm=256, th=1024,
                      compute_dtype=jnp.bfloat16,
                      vmem_limit_bytes=64 * 1024 * 1024):
    """Pallas implementation of Scale(scale, FeedForward)(x).

    x: (B, S, D), w1: (D, H), b1: (1, H), w2: (H, D), b2: (1, D), scale: scalar.
    """
    B, S, D = x.shape
    H = w1.shape[1]
    out_dtype = x.dtype

    # bf16 MXU inputs by default; accumulation / bias / GELU / scale stay f32.
    if compute_dtype is not None:
        x = x.astype(compute_dtype)
        w1 = w1.astype(compute_dtype)
        w2 = w2.astype(compute_dtype)
    b1 = b1.astype(jnp.float32)
    b2 = b2.astype(jnp.float32)

    xf = x.reshape(B * S, D)
    M = xf.shape[0]

    # Row tile: multiple of 16 for packed sub-32-bit vregs, else 8.  No row
    # padding: grid uses cdiv and Pallas masks the partial tail tile (the op is
    # row-independent, so garbage tail rows are never stored).
    row_align = 16 if jnp.dtype(xf.dtype).itemsize < 4 else 8
    tm_eff = min(_round_up(tm, row_align), _round_up(M, row_align))
    grid_m = pl.cdiv(M, tm_eff)

    # Lane-dense feature dims.  Typical conformer dims are already multiples of
    # 128 -> no activation pad / output slice (no extra HBM round trip).
    Dp = _round_up(D, 128)
    Hp = _round_up(H, 128)

    # Hidden-dim chunking (reduction axis) bounds per-step weight VMEM and the
    # (tm, th) intermediate; Hp <= th collapses to the fully resident kernel.
    num_k = pl.cdiv(Hp, min(th, Hp))
    th_eff = _round_up(pl.cdiv(Hp, num_k), 128)
    Hpad = th_eff * num_k

    if Dp != D:
        xf = jnp.pad(xf, ((0, 0), (0, Dp - D)))
    if Dp != D or Hpad != H:
        # Weight-only padding (one small copy, off the activation hot path).
        w1 = jnp.pad(w1, ((0, Dp - D), (0, Hpad - H)))
        b1 = jnp.pad(b1, ((0, 0), (0, Hpad - H)))
        w2 = jnp.pad(w2, ((0, Hpad - H), (0, Dp - D)))
        b2 = jnp.pad(b2, ((0, 0), (0, Dp - D)))

    # Dynamic / learned scale lives in SMEM -> no retrace per value.
    scale_arr = jnp.asarray(scale, dtype=jnp.float32).reshape(1)

    itemsize = jnp.dtype(xf.dtype).itemsize
    cost = pl.CostEstimate(
        flops=4 * M * D * H,                       # two matmuls
        transcendentals=M * H,                     # tanh GELU
        bytes_accessed=(xf.size * itemsize
                        + w1.size * itemsize + w2.size * itemsize
                        + (b1.size + b2.size) * 4
                        + M * Dp * jnp.dtype(out_dtype).itemsize),
    )

    def _spec(shape, index_map, constant):
        # Single-buffer operands whose block never changes across the grid:
        # default double-buffering would hold two VMEM copies of each resident
        # weight (critical on v7x 64 MiB/TC and v5e's scoped VMEM).
        if constant:
            return pl.BlockSpec(shape, index_map, pipeline_mode=pl.Buffered(1))
        return pl.BlockSpec(shape, index_map)

    resident = num_k == 1
    if resident:
        grid = (grid_m,)
        kernel = _ff_scale_kernel_resident
        in_specs = [
            pl.BlockSpec(memory_space=pltpu.MemorySpace.SMEM),        # scale
            pl.BlockSpec((tm_eff, Dp), lambda i: (i, 0)),             # x rows
            _spec((Dp, th_eff), lambda i: (0, 0), True),              # w1
            _spec((1, th_eff), lambda i: (0, 0), True),               # b1
            _spec((th_eff, Dp), lambda i: (0, 0), True),              # w2
            _spec((1, Dp), lambda i: (0, 0), True),                   # b2
        ]
        out_specs = pl.BlockSpec((tm_eff, Dp), lambda i: (i, 0))
        scratch_shapes = []
        dims = ("parallel",)
    else:
        grid = (grid_m, num_k)
        kernel = _ff_scale_kernel_hsplit
        in_specs = [
            pl.BlockSpec(memory_space=pltpu.MemorySpace.SMEM),        # scale
            pl.BlockSpec((tm_eff, Dp), lambda i, k: (i, 0)),          # x rows
            pl.BlockSpec((Dp, th_eff), lambda i, k: (0, k)),          # w1 chunk
            pl.BlockSpec((1, th_eff), lambda i, k: (0, k)),           # b1 chunk
            pl.BlockSpec((th_eff, Dp), lambda i, k: (k, 0)),          # w2 chunk
            _spec((1, Dp), lambda i, k: (0, 0), True),                # b2
        ]
        out_specs = pl.BlockSpec((tm_eff, Dp), lambda i, k: (i, 0))
        scratch_shapes = [pltpu.VMEM((tm_eff, Dp), jnp.float32)]
        dims = ("parallel", "arbitrary")

    out = pl.pallas_call(
        kernel,
        out_shape=jax.ShapeDtypeStruct((M, Dp), out_dtype),
        grid=grid,
        in_specs=in_specs,
        out_specs=out_specs,
        scratch_shapes=scratch_shapes,
        compiler_params=pltpu.CompilerParams(
            dimension_semantics=dims,
            vmem_limit_bytes=vmem_limit_bytes,
        ),
        cost_estimate=cost,
    )(scale_arr, xf, w1, b1, w2, b2)

    if Dp != D:
        out = out[:, :D]
    return out.reshape(B, S, D)


def _reference(x, w1, b1, w2, b2, scale):
    # Pure-JAX reference for Scale(scale, FeedForward)(x) (tanh GELU).
    h = jax.nn.gelu(x @ w1 + b1[0], approximate=True)
    return (h @ w2 + b2[0]) * scale


if __name__ == "__main__":
    scale = 0.5
    key = jax.random.PRNGKey(0)
    kx, k1, k2, k3, k4, kx2 = jax.random.split(key, 6)

    B, S, D, H = 2, 8, 32, 128     # batch, seq, dim, hidden (dim * 4)
    x = jax.random.normal(kx, (B, S, D), dtype=jnp.float32)
    w1 = jax.random.normal(k1, (D, H), dtype=jnp.float32) * 0.05
    b1 = jax.random.normal(k2, (1, H), dtype=jnp.float32) * 0.01
    w2 = jax.random.normal(k3, (H, D), dtype=jnp.float32) * 0.05
    b2 = jax.random.normal(k4, (1, D), dtype=jnp.float32) * 0.01

    y_ref = _reference(x, w1, b1, w2, b2, scale)

    # 1) f32 compute path, exact-math check (exercises D padding to 128).
    y32 = jax.block_until_ready(
        scale_feedforward(x, w1, b1, w2, b2, scale, compute_dtype=None))
    assert y32.shape == (B, S, D)
    assert jnp.allclose(y32, y_ref, atol=1e-5, rtol=1e-5)

    # 2) Default bf16 MXU path (looser tolerance: bf16 inputs, f32 accumulation).
    ybf = jax.block_until_ready(scale_feedforward(x, w1, b1, w2, b2, scale))
    assert ybf.shape == (B, S, D)
    assert jnp.allclose(ybf, y_ref, atol=3e-2, rtol=3e-2)

    # 3) Non-divisible row count: cdiv grid + masked partial tail tile (no M
    #    padding, no output row slice).  M = 600 -> 3 row tiles of 256.
    B2, S2 = 2, 300
    x2 = jax.random.normal(kx2, (B2, S2, D), dtype=jnp.float32)
    y2_ref = _reference(x2, w1, b1, w2, b2, scale)
    y2 = jax.block_until_ready(scale_feedforward(x2, w1, b1, w2, b2, scale))
    assert y2.shape == (B2, S2, D)
    assert jnp.allclose(y2, y2_ref, atol=3e-2, rtol=3e-2)

    # 4) H-chunked accumulator path (small th forces 2 reduction steps + H pad).
    y3 = jax.block_until_ready(
        scale_feedforward(x, w1, b1, w2, b2, scale, compute_dtype=None, th=64))
    assert jnp.allclose(y3, y_ref, atol=1e-5, rtol=1e-5)

    print("KERNEL_OK")
</pallas_src>

<mosaic_0001>
module attributes {stable_mosaic.version = 11 : i64} {
  func.func @_ff_scale_kernel_resident(%arg0: i32, %arg1: memref<1xf32, #tpu.memory_space<smem>>, %arg2: memref<16x128xf32, #tpu.memory_space<vmem>>, %arg3: memref<128x128xf32, #tpu.memory_space<vmem>>, %arg4: memref<1x128xf32, #tpu.memory_space<vmem>>, %arg5: memref<128x128xf32, #tpu.memory_space<vmem>>, %arg6: memref<1x128xf32, #tpu.memory_space<vmem>>, %arg7: memref<16x128xf32, #tpu.memory_space<vmem>>) attributes {dimension_semantics = [#tpu.dimension_semantics<parallel>], iteration_bounds = array<i64: 1>, scalar_prefetch = 0 : i64, scratch_operands = 0 : i64, tpu.core_type = #tpu.core_type<tc>, window_params = [{transform_indices = @transform_0, window_bounds = array<i64: 1>}, {transform_indices = @transform_1, window_bounds = array<i64: 16, 128>}, {pipeline_mode = #tpu.pipeline_mode<synchronous>, transform_indices = @transform_2, window_bounds = array<i64: 128, 128>}, {pipeline_mode = #tpu.pipeline_mode<synchronous>, transform_indices = @transform_3, window_bounds = array<i64: 1, 128>}, {pipeline_mode = #tpu.pipeline_mode<synchronous>, transform_indices = @transform_4, window_bounds = array<i64: 128, 128>}, {pipeline_mode = #tpu.pipeline_mode<synchronous>, transform_indices = @transform_5, window_bounds = array<i64: 1, 128>}, {transform_indices = @transform_6, window_bounds = array<i64: 16, 128>}]} {
    %c0 = arith.constant 0 : index
    %c0_0 = arith.constant 0 : index
    %0 = vector.load %arg2[%c0, %c0_0] : memref<16x128xf32, #tpu.memory_space<vmem>>, vector<16x128xf32>
    %c0_1 = arith.constant 0 : index
    %c0_2 = arith.constant 0 : index
    %1 = vector.load %arg3[%c0_1, %c0_2] : memref<128x128xf32, #tpu.memory_space<vmem>>, vector<128x128xf32>
    %cst = arith.constant dense<0.000000e+00> : vector<16x128xf32>
    %2 = tpu.matmul %0, %1, %cst {dimension_numbers = #tpu.dot_dimension_numbers<[1], [0], [0], [1], [0, 0, 1, 1], [], []>} : vector<16x128xf32>, vector<128x128xf32>, vector<16x128xf32> -> vector<16x128xf32>
    %c0_3 = arith.constant 0 : index
    %c0_4 = arith.constant 0 : index
    %3 = vector.load %arg4[%c0_3, %c0_4] : memref<1x128xf32, #tpu.memory_space<vmem>>, vector<1x128xf32>
    %4 = vector.broadcast %3 : vector<1x128xf32> to vector<16x128xf32>
    %5 = arith.addf %2, %4 : vector<16x128xf32>
    %6 = arith.mulf %5, %5 : vector<16x128xf32>
    %7 = arith.mulf %5, %6 : vector<16x128xf32>
    %cst_5 = arith.constant 4.471500e-02 : f32
    %8 = vector.broadcast %cst_5 : f32 to vector<16x128xf32>
    %9 = arith.mulf %8, %7 : vector<16x128xf32>
    %10 = arith.addf %5, %9 : vector<16x128xf32>
    %cst_6 = arith.constant 0.797884583 : f32
    %11 = vector.broadcast %cst_6 : f32 to vector<16x128xf32>
    %12 = arith.mulf %11, %10 : vector<16x128xf32>
    %13 = math.tanh %12 : vector<16x128xf32>
    %cst_7 = arith.constant 1.000000e+00 : f32
    %14 = vector.broadcast %cst_7 : f32 to vector<16x128xf32>
    %15 = arith.addf %14, %13 : vector<16x128xf32>
    %cst_8 = arith.constant 5.000000e-01 : f32
    %16 = vector.broadcast %cst_8 : f32 to vector<16x128xf32>
    %17 = arith.mulf %16, %15 : vector<16x128xf32>
    %18 = arith.mulf %5, %17 : vector<16x128xf32>
    %c0_9 = arith.constant 0 : index
    %c0_10 = arith.constant 0 : index
    %19 = vector.load %arg5[%c0_9, %c0_10] : memref<128x128xf32, #tpu.memory_space<vmem>>, vector<128x128xf32>
    %cst_11 = arith.constant dense<0.000000e+00> : vector<16x128xf32>
    %20 = tpu.matmul %18, %19, %cst_11 {dimension_numbers = #tpu.dot_dimension_numbers<[1], [0], [0], [1], [0, 0, 1, 1], [], []>} : vector<16x128xf32>, vector<128x128xf32>, vector<16x128xf32> -> vector<16x128xf32>
    %c0_12 = arith.constant 0 : index
    %c0_13 = arith.constant 0 : index
    %21 = vector.load %arg6[%c0_12, %c0_13] : memref<1x128xf32, #tpu.memory_space<vmem>>, vector<1x128xf32>
    %22 = vector.broadcast %21 : vector<1x128xf32> to vector<16x128xf32>
    %23 = arith.addf %20, %22 : vector<16x128xf32>
    %c0_14 = arith.constant 0 : index
    %24 = memref.load %arg1[%c0_14] : memref<1xf32, #tpu.memory_space<smem>>
    %25 = vector.broadcast %24 : f32 to vector<16x128xf32>
    %26 = arith.mulf %23, %25 : vector<16x128xf32>
    %c0_15 = arith.constant 0 : index
    %c0_16 = arith.constant 0 : index
    %27 = vector.load %arg7[%c0_15, %c0_16] : memref<16x128xf32, #tpu.memory_space<vmem>>, vector<16x128xf32>
    tpu.vector_store %arg7[%c0_15, %c0_16], %26 {strides = array<i32>} : memref<16x128xf32, #tpu.memory_space<vmem>>, vector<16x128xf32>,
    return
  }
  func.func @transform_0(%arg0: i32) -> i32 {
    %c0_i32 = arith.constant 0 : i32
    %c0_i32_0 = arith.constant 0 : i32
    return %c0_i32 : i32
  }
  func.func @transform_1(%arg0: i32) -> (i32, i32) {
    %c0_i32 = arith.constant 0 : i32
    %c0_i32_0 = arith.constant 0 : i32
    return %arg0, %c0_i32 : i32, i32
  }
  func.func @transform_2(%arg0: i32) -> (i32, i32) {
    %c0_i32 = arith.constant 0 : i32
    %c0_i32_0 = arith.constant 0 : i32
    %c0_i32_1 = arith.constant 0 : i32
    return %c0_i32, %c0_i32_0 : i32, i32
  }
  func.func @transform_3(%arg0: i32) -> (i32, i32) {
    %c0_i32 = arith.constant 0 : i32
    %c0_i32_0 = arith.constant 0 : i32
    %c0_i32_1 = arith.constant 0 : i32
    return %c0_i32, %c0_i32_0 : i32, i32
  }
  func.func @transform_4(%arg0: i32) -> (i32, i32) {
    %c0_i32 = arith.constant 0 : i32
    %c0_i32_0 = arith.constant 0 : i32
    %c0_i32_1 = arith.constant 0 : i32
    return %c0_i32, %c0_i32_0 : i32, i32
  }
  func.func @transform_5(%arg0: i32) -> (i32, i32) {
    %c0_i32 = arith.constant 0 : i32
    %c0_i32_0 = arith.constant 0 : i32
    %c0_i32_1 = arith.constant 0 : i32
    return %c0_i32, %c0_i32_0 : i32, i32
  }
  func.func @transform_6(%arg0: i32) -> (i32, i32) {
    %c0_i32 = arith.constant 0 : i32
    %c0_i32_0 = arith.constant 0 : i32
    return %arg0, %c0_i32 : i32, i32
  }
}

</mosaic_0001>

<bundles_post_ra>
// kernel: tpu_custom_call.1
= control target key start
LH: loop header
LB: loop body
LE: loop exit
PB: predicated region body
PF: predicated region fallthrough
CT: control target
= control target key end

     0   :  { %12 = vsyncpa [#allocation4], 0  ;;  %s791_s0 = inlined_call_operand.<no memory space> [shape: f32[1], index: 0, kind: input, shape index: {}]   ;;  %s792_s1 = inlined_call_operand.hbm [shape: f32[16,128], index: 1, kind: input, shape index: {}]   ;;  %s793_s2 = inlined_call_operand.hbm [shape: f32[128,128], index: 2, kind: input, shape index: {}]   ;;  %s794_s3 = inlined_call_operand.hbm [shape: f32[1,128], index: 3, kind: input, shape index: {}]   ;;  %s795_s4 = inlined_call_operand.hbm [shape: f32[128,128], index: 4, kind: input, shape index: {}]   ;;  %s796_s5 = inlined_call_operand.hbm [shape: f32[1,128], index: 5, kind: input, shape index: {}]   ;;  %s797_s6 = inlined_call_operand.hbm [shape: f32[16,128], index: 6, kind: output, shape index: {}]  }
   0x1   :  { %13 = vsyncpa [#allocation7], 0 }
   0x2   :  { %14 = vsyncpa [#allocation10], 0 }
   0x3   :  { %15 = vsyncpa [#allocation5], 0  ;;  %s654_s21 = smov [#allocation6]   ;;  %s655_s23 = smov [#allocation9]  }
   0x4   :  { %s35_s22 = sshll.u32 %s654_s21, 4  ;;  %s57_s24 = sshll.u32 %s655_s23, 4  ;;  %s36_s22 = int_to_ptr.vmem [resolvable:$true] %s35_s22  ;;  %s697_s24 = int_to_ptr.vmem [resolvable:$true] %s57_s24 }
   0x5   :  { %s514_s27 = scalar_lea.hbm %s793_s2, 2048 }
   0x6   :  { %p515_p0 = scmp.ne.s32.totalorder %s793_s2, %s514_s27  ;;  %p518_p1 = scmp.lt.u32.totalorder %s514_s27, %s793_s2 }
   0x8   :  { %p520_p2 = pnand %p518_p1, %p515_p0 }
   0xa   :  { %523 = shalt.err (!%p520_p2)
}
   0xb   :  { %s524_s8 = scalar_lea.vmem %s36_s22, 2048  ;;  %p529_p4 = scmp.lt.s32.totalorder %s36_s22, %s36_s22 }
   0xc   :  { %p525_p3 = scmp.ne.s32.totalorder %s36_s22, %s524_s8  ;;  %p530_p5 = scmp.lt.s32.totalorder %s524_s8, %s524_s8 }
   0xe   :  { %p531_p6 = por %p530_p5, %p529_p4 }
  0x10   :  { %p532_p7 = pnand %p531_p6, %p525_p3 }
  0x12   :  { %535 = shalt.err (!%p532_p7)
}
  0x13   :  { %s656_s9 = smov 128   ;;  %s657_s10 = smov 8  }
  0x14   :  { %41 = dma.hbm_to_vmem [thread:$0]  %s793_s2, 2048, %s36_s22, [#allocation7], %s656_s9, %s656_s9, %s657_s10  }
  0x15   :  { %s536_s15 = scalar_lea.hbm %s795_s4, 2048 }
  0x16   :  { %p537_p8 = scmp.ne.s32.totalorder %s795_s4, %s536_s15  ;;  %p540_p9 = scmp.lt.u32.totalorder %s536_s15, %s795_s4 }
  0x18   :  { %p542_p10 = pnand %p540_p9, %p537_p8 }
  0x1a   :  { %545 = shalt.err (!%p542_p10)
}
  0x1b   :  { %s546_s20 = scalar_lea.vmem %s697_s24, 2048  ;;  %p551_p12 = scmp.lt.s32.totalorder %s697_s24, %s697_s24 }
  0x1c   :  { %p547_p11 = scmp.ne.s32.totalorder %s697_s24, %s546_s20  ;;  %p552_p13 = scmp.lt.s32.totalorder %s546_s20, %s546_s20 }
  0x1e   :  { %p553_p0 = por %p552_p13, %p551_p12 }
  0x20   :  { %p554_p1 = pnand %p553_p0, %p547_p11 }
  0x22   :  { %557 = shalt.err (!%p554_p1)
}
  0x23   :  { %63 = dma.hbm_to_vmem [thread:$0]  %s795_s4, 2048, %s697_s24, [#allocation10], %s656_s9, %s656_s9, %s657_s10  }
  0x24   :  { %s658_s22 = smov [#allocation3]   ;;  %s659_s25 = smov [#allocation8]  }
  0x25   :  { %s23_s23 = sshll.u32 %s658_s22, 4  ;;  %s48_s26 = sshll.u32 %s659_s25, 4  ;;  %s24_s23 = int_to_ptr.vmem [resolvable:$true] %s23_s23  ;;  %s49_s26 = int_to_ptr.vmem [resolvable:$true] %s48_s26 }
  0x26   :  { %s558_s29 = scalar_lea.hbm %s792_s1, 256 }
  0x27   :  { %p559_p2 = scmp.ne.s32.totalorder %s792_s1, %s558_s29  ;;  %p562_p3 = scmp.lt.u32.totalorder %s558_s29, %s792_s1 }
  0x29   :  { %p564_p4 = pnand %p562_p3, %p559_p2 }
  0x2b   :  { %567 = shalt.err (!%p564_p4)
}
  0x2c   :  { %s568_s4 = scalar_lea.vmem %s24_s23, 256  ;;  %p573_p6 = scmp.lt.s32.totalorder %s24_s23, %s24_s23 }
  0x2d   :  { %p569_p5 = scmp.ne.s32.totalorder %s24_s23, %s568_s4  ;;  %p574_p7 = scmp.lt.s32.totalorder %s568_s4, %s568_s4 }
  0x2f   :  { %p575_p8 = por %p574_p7, %p573_p6 }
  0x31   :  { %p576_p9 = pnand %p575_p8, %p569_p5 }
  0x33   :  { %579 = shalt.err (!%p576_p9)
}
  0x34   :  { %29 = dma.hbm_to_vmem [thread:$0]  %s792_s1, 256, %s24_s23, [#allocation4], %s656_s9, %s656_s9, %s657_s10  }
  0x35   :  { %s580_s15 = scalar_lea.hbm %s794_s3, 16 }
  0x36   :  { %p581_p10 = scmp.ne.s32.totalorder %s794_s3, %s580_s15  ;;  %p584_p11 = scmp.lt.u32.totalorder %s580_s15, %s794_s3 }
  0x38   :  { %p586_p12 = pnand %p584_p11, %p581_p10 }
  0x3a   :  { %589 = shalt.err (!%p586_p12)
}
  0x3b   :  { %s590_s20 = scalar_lea.vmem %s49_s26, 16  ;;  %s594_s2 = scalar_lea.vmem %s49_s26, 32 }
  0x3c   :  { %p591_p13 = scmp.ne.s32.totalorder %s49_s26, %s590_s20  ;;  %p595_p0 = scmp.lt.s32.totalorder %s49_s26, %s49_s26 }
  0x3d   :  { %p596_p1 = scmp.lt.s32.totalorder %s594_s2, %s590_s20 }
  0x3f   :  { %p597_p2 = por %p596_p1, %p595_p0 }
  0x41   :  { %p598_p3 = pnand %p597_p2, %p591_p13 }
  0x43   :  { %601 = shalt.err (!%p598_p3)
}
  0x44   :  { %51 = dma.hbm_to_vmem [thread:$0]  %s794_s3, 16, %s49_s26, [#allocation7]  }
  0x45   :  { %s660_s22 = smov [#allocation11]   ;;  %s602_s28 = scalar_lea.hbm %s796_s5, 16 }
  0x46   :  { %s70_s23 = sshll.u32 %s660_s22, 4  ;;  %p603_p4 = scmp.ne.s32.totalorder %s796_s5, %s602_s28  ;;  %s71_s23 = int_to_ptr.vmem [resolvable:$true] %s70_s23 }
  0x47   :  { %p606_p5 = scmp.lt.u32.totalorder %s602_s28, %s796_s5 }
  0x49   :  { %p608_p6 = pnand %p606_p5, %p603_p4 }
  0x4b   :  { %611 = shalt.err (!%p608_p6)
}
  0x4c   :  { %s612_s11 = scalar_lea.vmem %s71_s23, 16  ;;  %s616_s3 = scalar_lea.vmem %s71_s23, 32 }
  0x4d   :  { %p613_p7 = scmp.ne.s32.totalorder %s71_s23, %s612_s11  ;;  %p617_p8 = scmp.lt.s32.totalorder %s71_s23, %s71_s23 }
  0x4e   :  { %p618_p9 = scmp.lt.s32.totalorder %s616_s3, %s612_s11 }
  0x50   :  { %p619_p10 = por %p618_p9, %p617_p8 }
  0x52   :  { %p620_p11 = pnand %p619_p10, %p613_p7 }
  0x54   :  { %623 = shalt.err (!%p620_p11)
}
  0x55   :  { %73 = dma.hbm_to_vmem [thread:$0]  %s796_s5, 16, %s71_s23, [#allocation10]  }
  0x56   :  { %646 = dma.done.wait [#allocation4], 256  }
  0x57   :  { %647 = vsyncadd [#allocation4], 4294967040 }
  0x58   :  { %648 = dma.done.wait [#allocation7], 2064  }
  0x59   :  { %649 = vsyncadd [#allocation7], 4294965232 }
  0x5a   :  { %650 = dma.done.wait [#allocation10], 2064  }
  0x5b   :  { %651 = vsyncadd [#allocation10], 4294965232  ;;  %v91_v0 = vld [vmem:[#allocation6] sm:$0xff]  ;;  %v92_v1 = vld [vmem:[#allocation6 + $0x8] sm:$0xff]  ;;  %s661_s12 = smov [#allocation12]  }
  0x5c   :  { %v93_v2 = vld [vmem:[#allocation6 + $0x10] sm:$0xff]  ;;  %v438_v3 = vpack.c.bf16 %v92_v1, %v91_v0  ;;  %v94_v4 = vld [vmem:[#allocation6 + $0x18] sm:$0xff]  ;;  %v95_v6 = vld [vmem:[#allocation6 + $0x20] sm:$0xff]  ;;  %s316_s13 = sshll.u32 %s661_s12, 4  ;;  %s317_s13 = int_to_ptr.vmem [resolvable:$true] %s316_s13 }
  0x5d   :  { %v442_v5 = vpack.c.bf16 %v94_v4, %v93_v2  ;;  %v96_v7 = vld [vmem:[#allocation6 + $0x28] sm:$0xff]  ;;  %v89_v9 = vld [vmem:[#allocation3] sm:$0xff]  ;;  %v98_v11 = vld [vmem:[#allocation6 + $0x38] sm:$0xff]  ;;  %s624_s14 = scalar_lea.vmem %s317_s13, 256  ;;  %p629_p13 = scmp.lt.s32.totalorder %s317_s13, %s317_s13 }
  0x5e   :  { %439 = vmatprep.subr.bf16.mxu0 %v438_v3  ;;  %v446_v8 = vpack.c.bf16 %v96_v7, %v95_v6  ;;  %v97_v10 = vld [vmem:[#allocation6 + $0x30] sm:$0xff]  ;;  %400 = vmatprep.mubr.f32.mxu0 %v89_v9  ;;  %v99_v13 = vld [vmem:[#allocation6 + $0x40] sm:$0xff]  ;;  %v100_v14 = vld [vmem:[#allocation6 + $0x48] sm:$0xff]  ;;  %p625_p12 = scmp.ne.s32.totalorder %s317_s13, %s624_s14  ;;  %p630_p0 = scmp.lt.s32.totalorder %s624_s14, %s624_s14 }
  0x5f   :  { %441 = vmatpush3.bf16.msra.mxu0 %v438_v3  ;;  %v450_v12 = vpack.c.bf16 %v98_v11, %v97_v10  ;;  %v454_v15 = vpack.c.bf16 %v100_v14, %v99_v13  ;;  %v101_v16 = vld [vmem:[#allocation6 + $0x50] sm:$0xff]  ;;  %v102_v17 = vld [vmem:[#allocation6 + $0x58] sm:$0xff]  ;;  %v103_v19 = vld [vmem:[#allocation6 + $0x60] sm:$0xff]  ;;  %v306_v11 = vstv %s791_s0 }
  0x60   :  { %443 = vmatprep.subr.bf16.mxu0 %v442_v5  ;;  %v458_v18 = vpack.c.bf16 %v102_v17, %v101_v16  ;;  %v104_v20 = vld [vmem:[#allocation6 + $0x68] sm:$0xff]  ;;  %v105_v22 = vld [vmem:[#allocation6 + $0x70] sm:$0xff]  ;;  %v106_v23 = vld [vmem:[#allocation6 + $0x78] sm:$0xff]  ;;  %p631_p1 = por %p630_p0, %p629_p13 }
  0x61   :  { %v462_v21 = vpack.c.bf16 %v104_v20, %v103_v19  ;;  %v466_v24 = vpack.c.bf16 %v106_v23, %v105_v22  ;;  %v90_v25 = vld [vmem:[#allocation3 + $0x8] sm:$0xff]  ;;  %v207_v26 = vld [vmem:[#allocation9] sm:$0xff]  ;;  %v208_v27 = vld [vmem:[#allocation9 + $0x8] sm:$0xff] }
  0x62   :  { %v470_v28 = vpack.c.bf16 %v208_v27, %v207_v26  ;;  %v209_v29 = vld [vmem:[#allocation9 + $0x10] sm:$0xff]  ;;  %v210_v30 = vld [vmem:[#allocation9 + $0x18] sm:$0xff]  ;;  %v211_v32 = vld [vmem:[#allocation9 + $0x20] sm:$0xff]  ;;  %p632_p2 = pnand %p631_p1, %p625_p12 }
  0x63   :  { %445 = vmatpush3.bf16.msra.mxu0 %v442_v5  ;;  %v474_v31 = vpack.c.bf16 %v210_v30, %v209_v29  ;;  %v212_v33 = vld [vmem:[#allocation9 + $0x28] sm:$0xff]  ;;  %v213_v35 = vld [vmem:[#allocation9 + $0x30] sm:$0xff]  ;;  %v214_v36 = vld [vmem:[#allocation9 + $0x38] sm:$0xff] }
  0x64   :  { %447 = vmatprep.subr.bf16.mxu0 %v446_v8  ;;  %471 = vmatprep.subr.bf16.mxu1 %v470_v28  ;;  %v478_v34 = vpack.c.bf16 %v212_v33, %v211_v32  ;;  %v482_v37 = vpack.c.bf16 %v214_v36, %v213_v35  ;;  %v215_v38 = vld [vmem:[#allocation9 + $0x40] sm:$0xff]  ;;  %v216_v39 = vld [vmem:[#allocation9 + $0x48] sm:$0xff]  ;;  %v217_v40 = vld [vmem:[#allocation9 + $0x50] sm:$0xff] }
  0x65   :  { %473 = vmatpush3.bf16.msra.mxu1 %v470_v28  ;;  %v486_v41 = vpack.c.bf16 %v216_v39, %v215_v38  ;;  %v218_v42 = vld [vmem:[#allocation9 + $0x58] sm:$0xff]  ;;  %v219_v44 = vld [vmem:[#allocation9 + $0x60] sm:$0xff]  ;;  %v220_v45 = vld [vmem:[#allocation9 + $0x68] sm:$0xff] }
  0x66   :  { %475 = vmatprep.subr.bf16.mxu1 %v474_v31  ;;  %v490_v43 = vpack.c.bf16 %v218_v42, %v217_v40  ;;  %v494_v46 = vpack.c.bf16 %v220_v45, %v219_v44  ;;  %v221_v47 = vld [vmem:[#allocation9 + $0x70] sm:$0xff]  ;;  %v222_v48 = vld [vmem:[#allocation9 + $0x78] sm:$0xff]  ;;  %v331_v9 = vld [vmem:[#allocation11] ss:$0 sm:$0xff] }
  0x67   :  { %449 = vmatpush3.bf16.msra.mxu0 %v446_v8  ;;  %v498_v49 = vpack.c.bf16 %v222_v48, %v221_v47  ;;  %v330_v50 = vld [vmem:[#allocation8] ss:$0 sm:$0xff] }
  0x68   :  { %451 = vmatprep.subr.bf16.mxu0 %v450_v12 }
  0x69   :  { %477 = vmatpush3.bf16.msra.mxu1 %v474_v31 }
  0x6a   :  { %479 = vmatprep.subr.bf16.mxu1 %v478_v34 }
  0x6b   :  { %453 = vmatpush3.bf16.msra.mxu0 %v450_v12 }
  0x6c   :  { %455 = vmatprep.subr.bf16.mxu0 %v454_v15 }
  0x6d   :  { %481 = vmatpush3.bf16.msra.mxu1 %v478_v34 }
  0x6e   :  { %483 = vmatprep.subr.bf16.mxu1 %v482_v37 }
  0x6f   :  { %457 = vmatpush3.bf16.msra.mxu0 %v454_v15 }
  0x70   :  { %459 = vmatprep.subr.bf16.mxu0 %v458_v18 }
  0x71   :  { %485 = vmatpush3.bf16.msra.mxu1 %v482_v37 }
  0x72   :  { %487 = vmatprep.subr.bf16.mxu1 %v486_v41 }
  0x73   :  { %461 = vmatpush3.bf16.msra.mxu0 %v458_v18 }
  0x74   :  { %463 = vmatprep.subr.bf16.mxu0 %v462_v21 }
  0x75   :  { %489 = vmatpush3.bf16.msra.mxu1 %v486_v41 }
  0x76   :  { %491 = vmatprep.subr.bf16.mxu1 %v490_v43 }
  0x77   :  { %465 = vmatpush3.bf16.msra.mxu0 %v462_v21 }
  0x78   :  { %467 = vmatprep.subr.bf16.mxu0 %v466_v24 }
  0x79   :  { %493 = vmatpush3.bf16.msra.mxu1 %v490_v43 }
  0x7a   :  { %495 = vmatprep.subr.bf16.mxu1 %v494_v46 }
  0x7b   :  { %469 = vmatpush3.bf16.msra.mxu0 %v466_v24 }
  0x7d   :  { %497 = vmatpush3.bf16.msra.mxu1 %v494_v46 }
  0x7e   :  { %401 = vmatmul.mubr.f32.vlgmr.msra.gmra.mrb[0].mxu0 %v90_v25  ;;  %499 = vmatprep.subr.bf16.mxu1 %v498_v49 }
  0x81   :  { %501 = vmatpush3.bf16.msra.mxu1 %v498_v49 }
 0x151   :  { %v402_v51 = vpop.f32.mrb[0].mxu0 }
 0x152   :  { %v186_v52 = vadd.f32 %v402_v51, %v330_v50  ;;  %v180_v53 = vpop.f32.mrb[1].mxu0 }
 0x153   :  { %v181_v54 = vadd.f32 %v330_v50, %v180_v53 }
 0x154   :  { %v190_v55 = vmul.f32 %v186_v52, %v186_v52 }
 0x155   :  { %v189_v56 = vmul.f32 %v181_v54, %v181_v54 }
 0x156   :  { %v192_v57 = vmul.f32 %v190_v55, %v186_v52 }
 0x157   :  { %v191_v58 = vmul.f32 %v189_v56, %v181_v54 }
 0x158   :  { %v194_v59 = vmul.f32 0.044715, %v192_v57 }
 0x159   :  { %v193_v60 = vmul.f32 0.044715, %v191_v58 }
 0x15a   :  { %v196_v61 = vadd.f32 %v194_v59, %v186_v52 }
 0x15b   :  { %v195_v62 = vadd.f32 %v193_v60, %v181_v54 }
 0x15c   :  { %v198_v63 = vmul.f32 0.7978846, %v196_v61 }
 0x15d   :  { %v197_v0 = vmul.f32 0.7978846, %v195_v62 }
 0x15e   :  { %510 = vtanh.f32 %v198_v63 }
 0x15f   :  { %512 = vtanh.f32 %v197_v0 }
 0x168   :  { %v511_v1 = vpop.eup %510 }
 0x169   :  { %v513_v2 = vpop.eup %512  ;;  %v202_v3 = vadd.f32 1.0, %v511_v1 }
 0x16a   :  { %v201_v4 = vadd.f32 1.0, %v513_v2 }
 0x16b   :  { %v204_v5 = vmul.f32 0.5, %v202_v3 }
 0x16c   :  { %v203_v6 = vmul.f32 0.5, %v201_v4 }
 0x16d   :  { %v206_v8 = vmul.f32 %v204_v5, %v186_v52 }
 0x16e   :  { %v205_v7 = vmul.f32 %v203_v6, %v181_v54 }
 0x170   :  { %435 = vmatprep.mubr.f32.mxu1 %v205_v7 }
 0x171   :  { %436 = vmatmul.mubr.f32.vlgmr.msra.gmra.mrb[0].mxu1 %v206_v8 }
 0x244   :  { %v437_v10 = vpop.f32.mrb[0].mxu1 }
 0x245   :  { %v302_v12 = vadd.f32 %v437_v10, %v331_v9  ;;  %v296_v13 = vpop.f32.mrb[1].mxu1 }
 0x246   :  { %v297_v14 = vadd.f32 %v331_v9, %v296_v13 }
 0x247   :  { %v308_v15 = vmul.f32 %v306_v11, %v302_v12 }
 0x248   :  { %v307_v16 = vmul.f32 %v306_v11, %v297_v14 }
 0x249   :  { %310 = vst [vmem:[#allocation12 + $0x8] sm:$0xff] %v308_v15 }
 0x24a   :  { %309 = vst [vmem:[#allocation12] sm:$0xff] %v307_v16 }
 0x24b   :  { %635 = shalt.err (!%p632_p2)
}
 0x24c   :  { %s636_s0 = scalar_lea.hbm %s797_s6, 256 }
 0x24d   :  { %p637_p3 = scmp.ne.s32.totalorder %s797_s6, %s636_s0  ;;  %p640_p4 = scmp.lt.u32.totalorder %s636_s0, %s797_s6 }
 0x24f   :  { %p642_p5 = pnand %p640_p4, %p637_p3 }
 0x251   :  { %645 = shalt.err (!%p642_p5)
}
 0x252   :  { %322 = dma.vmem_to_hbm [thread:$0]  %s317_s13, 256, %s797_s6, [#allocation5], %s656_s9, %s656_s9, %s657_s10  }
 0x253   :  { %652 = dma.done.wait [#allocation5], 256  }
 0x254   :  { %653 = vsyncadd [#allocation5], 4294967040 }
 0x255   :  { %326 = vsyncpa [#allocation4], 1 }
 0x256   :  { %327 = vsyncpa [#allocation7], 1 }
 0x257   :  { %328 = vsyncpa [#allocation10], 1 }
 0x258   :  { %329 = vsyncpa [#allocation5], 1 }

</bundles_post_ra>
